<compile_context>
chip_gen: v5e
topology: v5e:2x2
jax: 0.10.0
libtpu: 0.0.40
codegen_flags: <defaults>
</compile_context>

<pallas_src>
import jax
import jax.numpy as jnp
from jax.experimental import pallas as pl
from jax.experimental.pallas import tpu as pltpu


def attention_kernel(dec_ref, enc_ref, wdec_ref, wenc_ref, bias_ref,
                     out_ref, dec_part_ref, scores_ref):
    j = pl.program_id(1)                       # src_len tile index ("arbitrary")
    TS, TB, E2 = enc_ref.shape
    AP = wenc_ref.shape[1]

    # Decoder contribution (dec @ W_dec + bias): computed once per batch tile
    # on the first seq tile and kept resident in VMEM scratch across seq tiles.
    @pl.when(j == 0)
    def _():
        dec_part_ref[...] = (
            jnp.dot(dec_ref[...].astype(wdec_ref.dtype), wdec_ref[...],
                    preferred_element_type=jnp.float32)
            + bias_ref[...])                                        # (TB, AP) f32

    # Encoder contribution: one flattened (TS*TB, E2) x (E2, AP) MXU matmul
    # with f32 accumulation.  TB is always a multiple of the sublane tile
    # (wrapper pads the batch), so the reshape is layout-trivial.
    enc = enc_ref[...].reshape(TS * TB, E2).astype(wenc_ref.dtype)
    enc_part = jnp.dot(enc, wenc_ref[...],
                       preferred_element_type=jnp.float32).reshape(TS, TB, AP)

    # energy = tanh(cat([dec_rep, enc]) @ W + b); padded attn columns are
    # tanh(0) = 0 and add nothing to the reduction over attn_dim.
    energy = jnp.tanh(enc_part + dec_part_ref[...][None, :, :])     # (TS, TB, AP)
    scores = jnp.sum(energy, axis=2)                                # (TS, TB)

    # Accumulate raw scores into the per-batch-tile (S, TB) VMEM scratch
    # (sublane-offset dynamic store; lane-sparse but VMEM-only traffic).
    off = pl.multiple_of(j * TS, TS)
    scores_ref[pl.ds(off, TS), :] = scores

    # Softmax over src_len once all seq tiles of this batch tile have landed.
    # Transpose first (XLU, off the VALU/MXU slots) so exp, the reductions and
    # the final HBM store are all lane-dense (src_len in the lane dimension).
    @pl.when(j == pl.num_programs(1) - 1)
    def _():
        s = jnp.transpose(scores_ref[...])                          # (TB, S)
        m = jnp.max(s, axis=1, keepdims=True)
        e = jnp.exp(s - m)
        denom = jnp.sum(e, axis=1, keepdims=True)                   # (TB, 1)
        out_ref[...] = e * (1.0 / denom)       # exact divide on a tiny vector


def _tpu_budgets():
    """(vmem_limit_bytes, encoder_block_budget_bytes) per TPU generation."""
    try:
        kind = jax.devices()[0].device_kind.lower()
    except Exception:
        kind = ""
    if any(t in kind for t in ("v4", "v5", "v6")):
        # 128 MiB physical VMEM: bigger streaming tiles amortize the per-step
        # pipeline overhead and lengthen DMAs on the slower-HBM generations.
        return 64 * 1024 * 1024, 24 * 1024 * 1024
    # v7x (64 MiB physical / 32 MiB scoped) or unknown backend: conservative.
    return 32 * 1024 * 1024, 10 * 1024 * 1024


def _pick_batch_tile(b_pad, align, target=128):
    """Batch tile: divisor of the padded batch, multiple of the sublane tile,
    split in two if the whole batch would otherwise form a single 'parallel'
    block (v7x has 2 TensorCores and shards only 'parallel' grid axes)."""
    tb = b_pad
    if tb > target:
        for d in range(target, align - 1, -1):
            if b_pad % d == 0 and d % align == 0:
                tb = d
                break
    if b_pad // tb == 1 and tb >= 2 * align and (tb // 2) % align == 0:
        tb //= 2
    return tb


def _pick_seq_tile(S, tb, e2, itemsize, budget_bytes):
    """Largest divisor of S (preferring multiples of 8) whose double-buffered
    encoder block fits the per-generation streaming budget."""
    per_row = max(2 * tb * e2 * itemsize, 1)
    max_ts = max(8, int(budget_bytes) // per_row)
    if S <= max_ts:
        return S
    best8 = best_any = None
    for d in range(min(S, max_ts), 0, -1):
        if S % d:
            continue
        if best_any is None:
            best_any = d
        if d % 8 == 0:
            best8 = d
            break
    return best8 or best_any or S


def attention_forward(decoder_hidden, encoder_output, w, b, *,
                      matmul_dtype=jnp.bfloat16,
                      batch_tile_target=128,
                      vmem_limit_bytes=None,
                      enc_block_budget_bytes=None):
    """decoder_hidden: (B, dec_hid_dim)          (f32 or bf16)
       encoder_output: (src_len, B, 2*enc_hid_dim)  (PyTorch seq-major; f32 or bf16)
       w: (attn_in, attn_dim) with Linear(x) = x @ w + b   (w == W_torch.T)
       b: (attn_dim,)
       matmul_dtype: MXU operand dtype (default bf16; accumulation stays f32,
                     tanh/softmax stay f32)."""
    S, B, E2 = encoder_output.shape
    Ddec = decoder_hidden.shape[1]
    A = w.shape[1]
    assert w.shape[0] == Ddec + E2, "w must be (dec_hid_dim + 2*enc_hid_dim, attn_dim)"

    dflt_vmem, dflt_enc = _tpu_budgets()
    vmem_limit_bytes = int(vmem_limit_bytes or dflt_vmem)
    enc_block_budget_bytes = int(enc_block_budget_bytes or dflt_enc)

    # ---- weight prep (tiny, one-time) -------------------------------------
    # Split the concatenated-linear weight and lane-pad attn_dim to a multiple
    # of 128: lane-dense intermediates + full MXU N dim. Zero padding is exact.
    AP = ((A + 127) // 128) * 128
    pad_a = AP - A
    wdec = jnp.pad(w[:Ddec], ((0, 0), (0, pad_a))).astype(matmul_dtype)
    wenc = jnp.pad(w[Ddec:], ((0, 0), (0, pad_a))).astype(matmul_dtype)
    bias = jnp.pad(b, (0, pad_a)).astype(jnp.float32).reshape(1, AP)

    # ---- batch padding to a sublane multiple -------------------------------
    # Keeps the flattened MXU path always valid; padded (zero) rows only see a
    # row-wise softmax and are dropped after the kernel, so this is exact.
    in_itemsize = jnp.dtype(encoder_output.dtype).itemsize
    align = 16 if in_itemsize < 4 else 8
    b_pad = ((B + align - 1) // align) * align
    if b_pad != B:
        decoder_hidden = jnp.pad(decoder_hidden, ((0, b_pad - B), (0, 0)))
        encoder_output = jnp.pad(encoder_output, ((0, 0), (0, b_pad - B), (0, 0)))

    TB = _pick_batch_tile(b_pad, align, batch_tile_target)
    # Keep the resident (TB, S) output block + (S, TB) score scratch well
    # inside the scoped VMEM limit (matters for long sequences on v7x).
    while (3 * S * TB * 4 > vmem_limit_bytes // 2
           and TB >= 2 * align and (TB // 2) % align == 0):
        TB //= 2

    mm_itemsize = jnp.dtype(matmul_dtype).itemsize
    fixed = (3 * S * TB * 4                              # out block (x2) + score scratch
             + TB * AP * 4                               # dec_part scratch
             + 2 * (Ddec + E2 + 1) * AP * mm_itemsize    # resident weights / bias
             + 2 * TB * Ddec * in_itemsize)              # decoder block (x2)
    enc_budget = min(enc_block_budget_bytes,
                     max(vmem_limit_bytes - fixed - (4 << 20),
                         2 * 8 * TB * E2 * in_itemsize))
    TS = _pick_seq_tile(S, TB, E2, in_itemsize, enc_budget)
    grid = (b_pad // TB, S // TS)

    out = pl.pallas_call(
        attention_kernel,
        out_shape=jax.ShapeDtypeStruct((b_pad, S), jnp.float32),
        grid_spec=pltpu.PrefetchScalarGridSpec(
            num_scalar_prefetch=0,
            grid=grid,
            in_specs=[
                # decoder hidden: one block per batch tile (fetched once per i)
                pl.BlockSpec((TB, Ddec), lambda i, j: (i, 0)),
                # encoder output streamed seq-major straight from HBM
                pl.BlockSpec((TS, TB, E2), lambda i, j: (j, i, 0)),
                # weights / bias stay resident in VMEM across the whole grid
                pl.BlockSpec((Ddec, AP), lambda i, j: (0, 0)),
                pl.BlockSpec((E2, AP), lambda i, j: (0, 0)),
                pl.BlockSpec((1, AP), lambda i, j: (0, 0)),
            ],
            # Lane-dense (TB, S) output block resident across the seq
            # ("arbitrary") axis; written once on the last seq tile.
            out_specs=pl.BlockSpec((TB, S), lambda i, j: (i, 0)),
            scratch_shapes=[pltpu.VMEM((TB, AP), jnp.float32),   # dec@W_dec + b
                            pltpu.VMEM((S, TB), jnp.float32)],   # raw scores
        ),
        compiler_params=pltpu.CompilerParams(
            dimension_semantics=("parallel", "arbitrary"),
            vmem_limit_bytes=vmem_limit_bytes,
        ),
    )(decoder_hidden, encoder_output, wdec, wenc, bias)

    return out[:B] if b_pad != B else out


def attention_reference(decoder_hidden, encoder_output, w, b):
    """Pure-JAX reference mirroring the PyTorch forward exactly."""
    S = encoder_output.shape[0]
    rep = jnp.repeat(decoder_hidden[:, None, :], S, axis=1)          # (B, S, Ddec)
    enc = jnp.transpose(encoder_output, (1, 0, 2))                   # (B, S, E2)
    x = jnp.concatenate([rep, enc], axis=2)                          # (B, S, attn_in)
    energy = jnp.tanh(x @ w + b)                                     # (B, S, A)
    attention = jnp.sum(energy, axis=2)                              # (B, S)
    return jax.nn.softmax(attention, axis=1)


if __name__ == "__main__":
    # Small shapes implied by the module (batch=2, src_len=8, hidden=32).
    enc_hid_dim, dec_hid_dim, attn_dim = 16, 32, 32
    src_len, batch = 8, 2
    attn_in = 2 * enc_hid_dim + dec_hid_dim

    key = jax.random.PRNGKey(0)
    k_dec, k_enc, k_w, k_b = jax.random.split(key, 4)
    decoder_hidden = jax.random.normal(k_dec, (batch, dec_hid_dim), jnp.float32)
    encoder_output = jax.random.normal(
        k_enc, (src_len, batch, 2 * enc_hid_dim), jnp.float32)
    bound = 1.0 / (attn_in ** 0.5)
    w = jax.random.uniform(k_w, (attn_in, attn_dim), jnp.float32, -bound, bound)
    b = jax.random.uniform(k_b, (attn_dim,), jnp.float32, -bound, bound)

    ref = attention_reference(decoder_hidden, encoder_output, w, b)

    # Default path: bf16 MXU operands, f32 accumulation / tanh / softmax.
    out = jax.block_until_ready(
        attention_forward(decoder_hidden, encoder_output, w, b))
    assert out.shape == (batch, src_len)
    assert jnp.allclose(out, ref, atol=3e-2, rtol=3e-2), "bf16 kernel mismatch vs reference"

    # f32 MXU operands: tighter check of the kernel math / layout handling.
    out_f32 = jax.block_until_ready(
        attention_forward(decoder_hidden, encoder_output, w, b,
                          matmul_dtype=jnp.float32))
    assert jnp.allclose(out_f32, ref, atol=1e-3, rtol=1e-2), "f32 kernel mismatch vs reference"

    # Larger multi-tile smoke test: 2 parallel batch tiles x 4 seq tiles,
    # resident lane-dense output block, per-batch-tile dec_part scratch and
    # the flattened (TS*TB, E2) MXU path.  Small encoder budget forces TS < S.
    B2, S2, EH2, DH2, A2 = 16, 512, 128, 256, 128
    in2 = 2 * EH2 + DH2
    k1, k2, k3, k4 = jax.random.split(jax.random.PRNGKey(1), 4)
    dec2 = jax.random.normal(k1, (B2, DH2), jnp.float32)
    enc2 = jax.random.normal(k2, (S2, B2, 2 * EH2), jnp.float32)
    bnd2 = 1.0 / (in2 ** 0.5)
    w2 = jax.random.uniform(k3, (in2, A2), jnp.float32, -bnd2, bnd2)
    b2 = jax.random.uniform(k4, (A2,), jnp.float32, -bnd2, bnd2)
    out2 = jax.block_until_ready(
        attention_forward(dec2, enc2, w2, b2, matmul_dtype=jnp.float32,
                          enc_block_budget_bytes=2 * 1024 * 1024))
    ref2 = attention_reference(dec2, enc2, w2, b2)
    assert out2.shape == (B2, S2)
    assert jnp.allclose(out2, ref2, atol=1e-3, rtol=1e-2), "multi-tile mismatch vs reference"

    print("KERNEL_OK")
</pallas_src>

<mosaic_0001>
module attributes {stable_mosaic.version = 11 : i64} {
  func.func @attention_kernel(%arg0: i32, %arg1: i32, %arg2: memref<8x32xf32, #tpu.memory_space<vmem>>, %arg3: memref<8x8x32xf32, #tpu.memory_space<vmem>>, %arg4: memref<32x128xbf16, #tpu.memory_space<vmem>>, %arg5: memref<32x128xbf16, #tpu.memory_space<vmem>>, %arg6: memref<1x128xf32, #tpu.memory_space<vmem>>, %arg7: memref<8x8xf32, #tpu.memory_space<vmem>>, %arg8: memref<8x128xf32, #tpu.memory_space<vmem>>, %arg9: memref<8x8xf32, #tpu.memory_space<vmem>>) attributes {dimension_semantics = [#tpu.dimension_semantics<parallel>, #tpu.dimension_semantics<arbitrary>], iteration_bounds = array<i64: 1, 1>, scalar_prefetch = 0 : i64, scratch_operands = 2 : i64, tpu.core_type = #tpu.core_type<tc>, window_params = [{transform_indices = @transform_0, window_bounds = array<i64: 8, 32>}, {transform_indices = @transform_1, window_bounds = array<i64: 8, 8, 32>}, {pipeline_mode = #tpu.pipeline_mode<synchronous>, transform_indices = @transform_2, window_bounds = array<i64: 32, 128>}, {pipeline_mode = #tpu.pipeline_mode<synchronous>, transform_indices = @transform_3, window_bounds = array<i64: 32, 128>}, {pipeline_mode = #tpu.pipeline_mode<synchronous>, transform_indices = @transform_4, window_bounds = array<i64: 1, 128>}, {transform_indices = @transform_5, window_bounds = array<i64: 8, 8>}]} {
    %c0_i32 = arith.constant 0 : i32
    %0 = arith.cmpi eq, %arg1, %c0_i32 : i32
    %1 = arith.extui %0 : i1 to i32
    %c0_i32_0 = arith.constant 0 : i32
    %2 = arith.cmpi ne, %1, %c0_i32_0 : i32
    scf.if %2 {
      %c0_11 = arith.constant 0 : index
      %c0_12 = arith.constant 0 : index
      %22 = vector.load %arg2[%c0_11, %c0_12] : memref<8x32xf32, #tpu.memory_space<vmem>>, vector<8x32xf32>
      %23 = arith.truncf %22 : vector<8x32xf32> to vector<8x32xbf16>
      %c0_13 = arith.constant 0 : index
      %c0_14 = arith.constant 0 : index
      %24 = vector.load %arg4[%c0_13, %c0_14] : memref<32x128xbf16, #tpu.memory_space<vmem>>, vector<32x128xbf16>
      %cst_15 = arith.constant dense<0.000000e+00> : vector<8x128xf32>
      %25 = tpu.matmul %23, %24, %cst_15 {dimension_numbers = #tpu.dot_dimension_numbers<[1], [0], [0], [1], [0, 0, 1, 1], [], []>} : vector<8x32xbf16>, vector<32x128xbf16>, vector<8x128xf32> -> vector<8x128xf32>
      %c0_16 = arith.constant 0 : index
      %c0_17 = arith.constant 0 : index
      %26 = vector.load %arg6[%c0_16, %c0_17] : memref<1x128xf32, #tpu.memory_space<vmem>>, vector<1x128xf32>
      %27 = vector.broadcast %26 : vector<1x128xf32> to vector<8x128xf32>
      %28 = arith.addf %25, %27 : vector<8x128xf32>
      %c0_18 = arith.constant 0 : index
      %c0_19 = arith.constant 0 : index
      %29 = vector.load %arg8[%c0_18, %c0_19] : memref<8x128xf32, #tpu.memory_space<vmem>>, vector<8x128xf32>
      tpu.vector_store %arg8[%c0_18, %c0_19], %28 {strides = array<i32>} : memref<8x128xf32, #tpu.memory_space<vmem>>, vector<8x128xf32>,
    } else {
    }
    %c0 = arith.constant 0 : index
    %c0_1 = arith.constant 0 : index
    %c0_2 = arith.constant 0 : index
    %3 = vector.load %arg3[%c0, %c0_1, %c0_2] : memref<8x8x32xf32, #tpu.memory_space<vmem>>, vector<8x8x32xf32>
    %4 = vector.shape_cast %3 : vector<8x8x32xf32> to vector<64x32xf32>
    %5 = arith.truncf %4 : vector<64x32xf32> to vector<64x32xbf16>
    %c0_3 = arith.constant 0 : index
    %c0_4 = arith.constant 0 : index
    %6 = vector.load %arg5[%c0_3, %c0_4] : memref<32x128xbf16, #tpu.memory_space<vmem>>, vector<32x128xbf16>
    %cst = arith.constant dense<0.000000e+00> : vector<64x128xf32>
    %7 = tpu.matmul %5, %6, %cst {dimension_numbers = #tpu.dot_dimension_numbers<[1], [0], [0], [1], [0, 0, 1, 1], [], []>} : vector<64x32xbf16>, vector<32x128xbf16>, vector<64x128xf32> -> vector<64x128xf32>
    %8 = vector.shape_cast %7 : vector<64x128xf32> to vector<8x8x128xf32>
    %c0_5 = arith.constant 0 : index
    %c0_6 = arith.constant 0 : index
    %9 = vector.load %arg8[%c0_5, %c0_6] : memref<8x128xf32, #tpu.memory_space<vmem>>, vector<8x128xf32>
    %10 = vector.shape_cast %9 : vector<8x128xf32> to vector<1x8x128xf32>
    %11 = vector.broadcast %10 : vector<1x8x128xf32> to vector<8x8x128xf32>
    %12 = arith.addf %8, %11 : vector<8x8x128xf32>
    %13 = math.tanh %12 : vector<8x8x128xf32>
    %cst_7 = arith.constant dense<0.000000e+00> : vector<8x8xf32>
    %14 = vector.multi_reduction <add>, %13, %cst_7 [2] : vector<8x8x128xf32> to vector<8x8xf32>
    %c8_i32 = arith.constant 8 : i32
    %15 = arith.muli %arg1, %c8_i32 : i32
    %16 = tpu.assume_multiple %15, 8 : i32
    %17 = arith.index_cast %16 : i32 to index
    %c0_8 = arith.constant 0 : index
    %18 = vector.load %arg9[%17, %c0_8] : memref<8x8xf32, #tpu.memory_space<vmem>>, vector<8x8xf32>
    tpu.vector_store %arg9[%17, %c0_8], %14 {strides = array<i32>} : memref<8x8xf32, #tpu.memory_space<vmem>>, vector<8x8xf32>,
    %c0_i32_9 = arith.constant 0 : i32
    %19 = arith.cmpi eq, %arg1, %c0_i32_9 : i32
    %20 = arith.extui %19 : i1 to i32
    %c0_i32_10 = arith.constant 0 : i32
    %21 = arith.cmpi ne, %20, %c0_i32_10 : i32
    scf.if %21 {
      %c0_11 = arith.constant 0 : index
      %c0_12 = arith.constant 0 : index
      %22 = vector.load %arg9[%c0_11, %c0_12] : memref<8x8xf32, #tpu.memory_space<vmem>>, vector<8x8xf32>
      %23 = tpu.transpose %22, [1, 0] : vector<8x8xf32> -> vector<8x8xf32>
      %cst_13 = arith.constant dense<0xFF800000> : vector<8xf32>
      %24 = vector.multi_reduction <maximumf>, %23, %cst_13 [1] : vector<8x8xf32> to vector<8xf32>
      %25 = vector.shape_cast %24 : vector<8xf32> to vector<8x1xf32>
      %26 = vector.broadcast %25 : vector<8x1xf32> to vector<8x8xf32>
      %27 = arith.subf %23, %26 : vector<8x8xf32>
      %28 = math.exp %27 : vector<8x8xf32>
      %cst_14 = arith.constant dense<0.000000e+00> : vector<8xf32>
      %29 = vector.multi_reduction <add>, %28, %cst_14 [1] : vector<8x8xf32> to vector<8xf32>
      %30 = vector.shape_cast %29 : vector<8xf32> to vector<8x1xf32>
      %cst_15 = arith.constant 1.000000e+00 : f32
      %31 = vector.broadcast %cst_15 : f32 to vector<8x1xf32>
      %32 = arith.divf %31, %30 : vector<8x1xf32>
      %33 = vector.broadcast %32 : vector<8x1xf32> to vector<8x8xf32>
      %34 = arith.mulf %28, %33 : vector<8x8xf32>
      %c0_16 = arith.constant 0 : index
      %c0_17 = arith.constant 0 : index
      %35 = vector.load %arg7[%c0_16, %c0_17] : memref<8x8xf32, #tpu.memory_space<vmem>>, vector<8x8xf32>
      tpu.vector_store %arg7[%c0_16, %c0_17], %34 {strides = array<i32>} : memref<8x8xf32, #tpu.memory_space<vmem>>, vector<8x8xf32>,
    } else {
    }
    return
  }
  func.func @transform_0(%arg0: i32, %arg1: i32) -> (i32, i32) {
    %c0_i32 = arith.constant 0 : i32
    %c0_i32_0 = arith.constant 0 : i32
    return %arg0, %c0_i32 : i32, i32
  }
  func.func @transform_1(%arg0: i32, %arg1: i32) -> (i32, i32, i32) {
    %c0_i32 = arith.constant 0 : i32
    %c0_i32_0 = arith.constant 0 : i32
    return %arg1, %arg0, %c0_i32 : i32, i32, i32
  }
  func.func @transform_2(%arg0: i32, %arg1: i32) -> (i32, i32) {
    %c0_i32 = arith.constant 0 : i32
    %c0_i32_0 = arith.constant 0 : i32
    %c0_i32_1 = arith.constant 0 : i32
    return %c0_i32, %c0_i32_0 : i32, i32
  }
  func.func @transform_3(%arg0: i32, %arg1: i32) -> (i32, i32) {
    %c0_i32 = arith.constant 0 : i32
    %c0_i32_0 = arith.constant 0 : i32
    %c0_i32_1 = arith.constant 0 : i32
    return %c0_i32, %c0_i32_0 : i32, i32
  }
  func.func @transform_4(%arg0: i32, %arg1: i32) -> (i32, i32) {
    %c0_i32 = arith.constant 0 : i32
    %c0_i32_0 = arith.constant 0 : i32
    %c0_i32_1 = arith.constant 0 : i32
    return %c0_i32, %c0_i32_0 : i32, i32
  }
  func.func @transform_5(%arg0: i32, %arg1: i32) -> (i32, i32) {
    %c0_i32 = arith.constant 0 : i32
    %c0_i32_0 = arith.constant 0 : i32
    return %arg0, %c0_i32 : i32, i32
  }
}

</mosaic_0001>

<bundles_post_ra>
// kernel: tpu_custom_call.1
= control target key start
LH: loop header
LB: loop body
LE: loop exit
PB: predicated region body
PF: predicated region fallthrough
CT: control target
= control target key end

     0   :  { %10 = vsyncpa [#allocation5], 0  ;;  %s597_s0 = inlined_call_operand.hbm [shape: f32[8,32], index: 0, kind: input, shape index: {}]   ;;  %s598_s1 = inlined_call_operand.hbm [shape: f32[8,8,32], index: 1, kind: input, shape index: {}]   ;;  %s599_s2 = inlined_call_operand.hbm [shape: bf16[32,128], index: 2, kind: input, shape index: {}]   ;;  %s600_s3 = inlined_call_operand.hbm [shape: bf16[32,128], index: 3, kind: input, shape index: {}]   ;;  %s601_s4 = inlined_call_operand.vmem [shape: f32[1,128], index: 4, kind: input, shape index: {}]   ;;  %s602_s5 = inlined_call_operand.hbm [shape: f32[8,8], index: 5, kind: output, shape index: {}]  }
   0x1   :  { %11 = vsyncpa [#allocation8], 0 }
   0x2   :  { %12 = vsyncpa [#allocation11], 0  ;;  %s29_s20 = sshll.u32 %s598_s1, 4  ;;  %s30_s20 = int_to_ptr.hbm [resolvable:$true] %s29_s20 }
   0x3   :  { %13 = vsyncpa [#allocation6], 0  ;;  %s536_s21 = smov [#allocation7]   ;;  %s19_s25 = sshll.u32 %s597_s0, 4  ;;  %s20_s25 = int_to_ptr.hbm [resolvable:$true] %s19_s25 }
   0x4   :  { %s31_s22 = sshll.u32 %s536_s21, 4  ;;  %s537_s26 = smov 128   ;;  %s32_s22 = int_to_ptr.vmem [resolvable:$true] %s31_s22 }
   0x5   :  { %s538_s27 = smov 8   ;;  %s539_s28 = smov [#allocation4]  }
   0x6   :  { %37 = dma.hbm_to_vmem [thread:$0]  %s30_s20, 1024, %s32_s22, [#allocation8], %s537_s26, %s537_s26, %s538_s27  }
   0x7   :  { %s21_s29 = sshll.u32 %s539_s28, 4  ;;  %s42_s7 = sshll.u32 %s599_s2, 4  ;;  %s22_s29 = int_to_ptr.vmem [resolvable:$true] %s21_s29  ;;  %s43_s7 = int_to_ptr.hbm [resolvable:$true] %s42_s7 }
   0x8   :  { %24 = dma.hbm_to_vmem [thread:$0]  %s20_s25, 128, %s22_s29, [#allocation5]  }
   0x9   :  { %s540_s1 = smov [#allocation9]   ;;  %s55_s0 = sshll.u32 %s600_s3, 4  ;;  %s56_s0 = int_to_ptr.hbm [resolvable:$true] %s55_s0 }
   0xa   :  { %s44_s8 = sshll.u32 %s540_s1, 4  ;;  %s541_s11 = smov 64   ;;  %s45_s8 = int_to_ptr.vmem [resolvable:$true] %s44_s8 }
   0xb   :  { %s542_s12 = smov 4   ;;  %s543_s13 = smov [#allocation10]  }
   0xc   :  { %50 = dma.hbm_to_vmem [thread:$0]  %s43_s7, 256, %s45_s8, [#allocation8], %s541_s11, %s541_s11, %s542_s12  }
   0xd   :  { %s57_s14 = sshll.u32 %s543_s13, 4  ;;  %s58_s14 = int_to_ptr.vmem [resolvable:$true] %s57_s14 }
   0xe   :  { %63 = dma.hbm_to_vmem [thread:$0]  %s56_s0, 256, %s58_s14, [#allocation11], %s541_s11, %s541_s11, %s542_s12  }
   0xf   :  { %528 = dma.done.wait [#allocation5], 128  }
  0x10   :  { %529 = vsyncadd [#allocation5], 4294967168 }
  0x11   :  { %530 = dma.done.wait [#allocation8], 1280  }
  0x12   :  { %531 = vsyncadd [#allocation8], 4294966016 }
  0x13   :  { %532 = dma.done.wait [#allocation11], 256  }
  0x14   :  { %533 = vsyncadd [#allocation11], 4294967040  ;;  %v370_v0 = vld [vmem:[#allocation9 + $0x8] sm:$0xff]  ;;  %v372_v1 = vld [vmem:[#allocation10 + $0x8] sm:$0xff]  ;;  %vm109_vm0 = vcmask 261120   ;;  %v239_v48 = vlaneseq  ;;  %vm249_vm1 = vcmask 1041409  }
  0x15   :  { %v369_v2 = vld [vmem:[#allocation9] sm:$0xff]  ;;  %v371_v3 = vld [vmem:[#allocation10] sm:$0xff]  ;;  %v87_v4 = vld [vmem:[#allocation4] sm:$0xff]  ;;  %119 = vmatpush.bf16.msra.mxu0 %v370_v0  ;;  %373 = vmatpush.bf16.msra.mxu2 %v372_v1  ;;  %vm251_vm2 = vcmask 1042434   ;;  %vm253_vm3 = vcmask 1043459   ;;  %vm255_vm4 = vcmask 1044484  }
  0x16   :  { %v129_v5 = vld [vmem:[#allocation7 + $0x10] sm:$0xff]  ;;  %v130_v6 = vld [vmem:[#allocation7 + $0x18] sm:$0xff]  ;;  %374 = vmatpush.bf16.msra.mxu3 %v372_v1  ;;  %174 = vmatpush.bf16.msra.mxu1 %v372_v1  ;;  %v127_v9 = vld [vmem:[#allocation7] sm:$0xff]  ;;  %v88_v11 = vpack.c.bf16 %v87_v4, %v87_v4  ;;  %v240_v51 = vand.u32 127, %v239_v48  ;;  %vm257_vm5 = vcmask 1045509   ;;  %vm259_vm6 = vcmask 1046534  }
  0x17   :  { %v133_v7 = vld [vmem:[#allocation7 + $0x30] sm:$0xff]  ;;  %v134_v8 = vld [vmem:[#allocation7 + $0x38] sm:$0xff]  ;;  %v128_v10 = vld [vmem:[#allocation7 + $0x8] sm:$0xff]  ;;  %v136_v12 = vpack.c.bf16 %v130_v6, %v129_v5  ;;  %vm261_vm7 = vcmask 1047559   ;;  %vm265_vm8 = vcmask 64512   ;;  %s336_s18 = sshll.u32 %s602_s5, 4  ;;  %s337_s18 = int_to_ptr.hbm [resolvable:$true] %s336_s18 }
  0x18   :  { %v138_v13 = vpack.c.bf16 %v134_v8, %v133_v7  ;;  %v135_v14 = vpack.c.bf16 %v128_v10, %v127_v9  ;;  %v131_v15 = vld [vmem:[#allocation7 + $0x20] sm:$0xff]  ;;  %v132_v16 = vld [vmem:[#allocation7 + $0x28] sm:$0xff]  ;;  %v387_v18 = vld [vmem:[%s601_s4] ss:$0 sm:$0xff]  ;;  %s544_s4 = smov [#allocation12]  }
  0x19   :  { %120 = vmatpush.bf16.msra.mxu0 %v369_v2  ;;  %375 = vmatpush.bf16.msra.mxu2 %v371_v3  ;;  %v137_v17 = vpack.c.bf16 %v132_v16, %v131_v15  ;;  %s334_s15 = sshll.u32 %s544_s4, 4  ;;  %s335_s15 = int_to_ptr.vmem [resolvable:$true] %s334_s15 }
  0x1a   :  { %376 = vmatpush.bf16.msra.mxu3 %v371_v3  ;;  %175 = vmatpush.bf16.msra.mxu1 %v371_v3 }
  0x1c   :  { %356 = vmatmul.msk.bf16.vlgmr.msra.gmra.mxu0 %vm109_vm0, %v88_v11  ;;  %366 = vmatmul.msk.bf16.vlgmr.msra.gmra.mxu2 %vm109_vm0, %v136_v12 }
  0x1d   :  { %368 = vmatmul.msk.bf16.vlgmr.msra.gmra.mxu3 %vm109_vm0, %v138_v13  ;;  %365 = vmatmul.msk.bf16.vlgmr.msra.gmra.mxu1 %vm109_vm0, %v135_v14 }
  0x2c   :  { %367 = vmatmul.msk.bf16.gmra.mxu2 %vm109_vm0, %v137_v17 }
  0x99   :  { %v122_v19 = vpop.f32.mrf.mxu0 }
  0x9a   :  { %v123_v20 = vadd.f32 %v387_v18, %v122_v19  ;;  %v177_v21 = vpop.f32.mrf.mxu1 }
  0x9c   :  { %v198_v22 = vadd.f32 %v177_v21, %v123_v20 }
  0x9e   :  { %388 = vtanh.f32 %v198_v22 }
  0x9f   :  { %v182_v23 = vpop.f32.mrf.mxu2 }
  0xa0   :  { %v200_v24 = vadd.f32 %v182_v23, %v123_v20  ;;  %v192_v25 = vpop.f32.mrf.mxu3 }
  0xa1   :  { %v124_v26 = vpop.f32.mrf.mxu0  ;;  %v204_v33 = vadd.f32 %v192_v25, %v123_v20 }
  0xa2   :  { %390 = vtanh.f32 %v200_v24  ;;  %v179_v27 = vpop.f32.mrf.mxu1 }
  0xa3   :  { %v199_v28 = vadd.f32 %v179_v27, %v123_v20 }
  0xa4   :  { %v389_v29 = vpop.eup %388 }
  0xa5   :  { %392 = vtanh.f32 %v199_v28  ;;  %214 = vadd.xlane.f32.xlu0 %v389_v29 }
  0xa7   :  { %v184_v30 = vpop.f32.mrf.mxu2 }
  0xa8   :  { %v391_v31 = vpop.eup %390  ;;  %v201_v32 = vadd.f32 %v184_v30, %v123_v20  ;;  %v194_v34 = vpop.f32.mrf.mxu3 }
  0xa9   :  { %218 = vadd.xlane.f32.xlu1 %v391_v31  ;;  %v205_v36 = vadd.f32 %v194_v34, %v123_v20 }
  0xaa   :  { %394 = vtanh.f32 %v201_v32 }
  0xab   :  { %v393_v35 = vpop.eup %392  ;;  %396 = vtanh.f32 %v204_v33 }
  0xac   :  { %398 = vtanh.f32 %v205_v36 }
  0xad   :  { %216 = vadd.xlane.f32.xlu0 %v393_v35 }
  0xaf   :  { %v187_v37 = vpop.f32.mrf.mxu2 }
  0xb0   :  { %v395_v38 = vpop.eup %394  ;;  %v202_v39 = vadd.f32 %v187_v37, %v123_v20 }
  0xb1   :  { %220 = vadd.xlane.f32.xlu1 %v395_v38  ;;  %v397_v40 = vpop.eup %396 }
  0xb2   :  { %400 = vtanh.f32 %v202_v39  ;;  %v399_v41 = vpop.eup %398 }
  0xb5   :  { %226 = vadd.xlane.f32.xlu0 %v397_v40 }
  0xb7   :  { %v189_v42 = vpop.f32.mrf.mxu2 }
  0xb8   :  { %v401_v43 = vpop.eup %400  ;;  %v203_v44 = vadd.f32 %v189_v42, %v123_v20 }
  0xb9   :  { %222 = vadd.xlane.f32.xlu2 %v401_v43  ;;  %228 = vadd.xlane.f32.xlu1 %v399_v41 }
  0xba   :  { %402 = vtanh.f32 %v203_v44 }
  0xc0   :  { %v403_v45 = vpop.eup %402 }
  0xc1   :  { %224 = vadd.xlane.f32.xlu2 %v403_v45 }
 0x118   :  { %v215_v46 = vpop.xlane.xlu0 %214 }
 0x119   :  { %v241_v53 = vperm.slane %v215_v46, %v240_v51 }
 0x11c   :  { %v219_v47 = vpop.xlane.xlu1 %218 }
 0x11d   :  { %v243_v57 = vperm.slane %v219_v47, %v240_v51 }
 0x120   :  { %v217_v49 = vpop.xlane.xlu0 %216 }
 0x121   :  { %v242_v54 = vperm.slane %v217_v49, %v240_v51 }
 0x123   :  { %v250_v55 = vsel %vm249_vm1, %v242_v54, %v241_v53 }
 0x124   :  { %v221_v50 = vpop.xlane.xlu1 %220  ;;  %v252_v60 = vsel %vm251_vm2, %v243_v57, %v250_v55 }
 0x125   :  { %v244_v56 = vperm.slane %v221_v50, %v240_v51 }
 0x127   :  { %v254_v63 = vsel %vm253_vm3, %v244_v56, %v252_v60 }
 0x128   :  { %v227_v59 = vpop.xlane.xlu0 %226 }
 0x129   :  { %v247_v1 = vperm.slane %v227_v59, %v240_v51 }
 0x12c   :  { %v223_v52 = vpop.xlane.xlu2 %222  ;;  %v229_v61 = vpop.xlane.xlu1 %228 }
 0x12d   :  { %v245_v58 = vperm.slane %v223_v52, %v240_v51  ;;  %v248_v3 = vperm.slane %v229_v61, %v240_v51 }
 0x12f   :  { %v256_v2 = vsel %vm255_vm4, %v245_v58, %v254_v63 }
 0x134   :  { %v225_v62 = vpop.xlane.xlu2 %224 }
 0x135   :  { %v246_v0 = vperm.slane %v225_v62, %v240_v51 }
 0x137   :  { %v258_v4 = vsel %vm257_vm5, %v246_v0, %v256_v2 }
 0x138   :  { %v260_v5 = vsel %vm259_vm6, %v247_v1, %v258_v4 }
 0x139   :  { %v262_v6 = vsel %vm261_vm7, %v248_v3, %v260_v5 }
 0x13a   :  { %266 = vst.msk [vmem:[#allocation3] sm:$0xff] %vm265_vm8, %v262_v6 }
 0x141   :  { %v270_v7 = vld [vmem:[#allocation3] sm:$0xff] }
 0x142   :  { %271 = vxpose.xlu2.b32.start.end [1/1] (short) (narrow) %v270_v7, 8 }
 0x1db   :  { %v287_v8 = vpop.trf.xlu2 }
 0x1dc   :  { %v303_v9 = vsel %vm265_vm8, %v287_v8, -inf }
 0x1dd   :  { %304 = vmax.xlane.f32.xlu0 %v303_v9 }
 0x250   :  { %v305_v10 = vpop.xlane.xlu0 %304 }
 0x251   :  { %v306_v11 = vsub.f32 %v287_v8, %v305_v10 }
 0x253   :  { %v307_v12 = vmul.f32 1.442695, %v306_v11 }
 0x255   :  { %404 = vpow2.f32 %v307_v12 }
 0x25b   :  { %v405_v13 = vpop.eup %404 }
 0x25c   :  { %v309_v14 = vsel %vm265_vm8, %v405_v13, 0.0 }
 0x25d   :  { %310 = vadd.xlane.f32.xlu1 %v309_v14 }
 0x2d0   :  { %v311_v15 = vpop.xlane.xlu1 %310 }
 0x2d1   :  { %406 = vrcp.f32 %v311_v15  ;;  %v323_v19 = vand.u32 2147483648, %v311_v15  ;;  %v321_v21 = vand.u32 2147483647, %v311_v15  ;;  %vm317_vm10 = vweird.f32 %v311_v15 }
 0x2d3   :  { %v324_v23 = vor.u32 1.1754944e-38, %v323_v19  ;;  %vm322_vm12 = vcmp.eq.f32.partialorder %v321_v21, 8.507059e+37 }
 0x2d7   :  { %v407_v16 = vpop.eup %406 }
 0x2d8   :  { %v313_v17 = vmul.f32 %v407_v16, %v311_v15  ;;  %vm318_vm9 = vweird.f32 %v407_v16 }
 0x2d9   :  { %vm319_vm11 = vmor %vm317_vm10, %vm318_vm9 }
 0x2da   :  { %v314_v18 = vsub.f32 1.0, %v313_v17 }
 0x2dc   :  { %v315_v20 = vmul.f32 %v407_v16, %v314_v18 }
 0x2de   :  { %v316_v22 = vadd.f32 %v407_v16, %v315_v20 }
 0x2e0   :  { %v320_v24 = vsel %vm319_vm11, %v407_v16, %v316_v22 }
 0x2e1   :  { %v325_v25 = vsel %vm322_vm12, %v324_v23, %v320_v24 }
 0x2e2   :  { %v327_v26 = vmul.f32 %v405_v13, %v325_v25 }
 0x2e4   :  { %328 = vst.msk [vmem:[#allocation12] sm:$0xff] %vm265_vm8, %v327_v26 }
 0x2e5   :  { %339 = dma.vmem_to_hbm [thread:$0]  %s335_s15, 128, %s337_s18, [#allocation6]  }
 0x2e6   :  { %534 = dma.done.wait [#allocation6], 128  }
 0x2e7   :  { %535 = vsyncadd [#allocation6], 4294967168 }
 0x2e8   :  { %344 = vsyncpa [#allocation5], 1 }
 0x2e9   :  { %345 = vsyncpa [#allocation8], 1 }
 0x2ea   :  { %346 = vsyncpa [#allocation11], 1 }
 0x2eb   :  { %347 = vsyncpa [#allocation6], 1 }

</bundles_post_ra>
